<compile_context>
chip_gen: v7x
topology: tpu7x:2x2x1
jax: 0.10.0
libtpu: 0.0.40
codegen_flags: <defaults>
</compile_context>

<pallas_src>
import functools
import math

import numpy as np
import jax
import jax.numpy as jnp
from jax.experimental import pallas as pl
from jax.experimental.pallas import tpu as pltpu

EPS = 1e-5
LEAKY_SLOPE = 0.01  # InPlaceABNSync default activation: leaky_relu(0.01)


def _round_up(x, m):
    return ((x + m - 1) // m) * m


# ---------------------------------------------------------------------------
# Pallas kernel 1: single-block matmul fused with bias add (+ optional
# leaky-ReLU).  Used for the batched PSP-stage 1x1 convs and the standalone
# head (feat_layer == 'last').  K and N always fit in one VMEM block here.
# ---------------------------------------------------------------------------
def _mm_bias_act_kernel(x_ref, w_ref, b_ref, o_ref, *, slope):
    y = jnp.dot(x_ref[...], w_ref[...], preferred_element_type=jnp.float32)
    y = y + b_ref[...]
    if slope is not None:
        y = jnp.maximum(y, y * slope)        # leaky_relu, single vmax
    o_ref[...] = y.astype(o_ref.dtype)


def mm_bias_act(x, w, b, *, slope=None, tm=None):
    """act((x @ w) + b); x/w bf16, b f32, out f32.  Operands are already
    (8,128)-aligned (weights pre-padded in init_params), so no pad copies."""
    M, K = x.shape
    K2, N = w.shape
    assert K == K2 and b.shape == (1, N)
    if tm is None or tm >= M or M % tm != 0:
        tm = M
    grid = (M // tm,)
    return pl.pallas_call(
        functools.partial(_mm_bias_act_kernel, slope=slope),
        out_shape=jax.ShapeDtypeStruct((M, N), jnp.float32),
        grid=grid,
        in_specs=[
            pl.BlockSpec((tm, K), lambda i: (i, 0)),
            pl.BlockSpec((K, N), lambda i: (0, 0)),
            pl.BlockSpec((1, N), lambda i: (0, 0)),
        ],
        out_specs=pl.BlockSpec((tm, N), lambda i: (i, 0)),
        compiler_params=pltpu.CompilerParams(
            dimension_semantics=("parallel",)),
    )(x, w, b)


# ---------------------------------------------------------------------------
# Pallas kernel 2: bottleneck 3x3 conv (BN folded, leaky-ReLU) fused with the
# 1x1 head conv.  Implicit im2col with kw folded into K and kh folded into N:
#   xs_ref : ((th+2)*w, 3*Cin)    rows = padded input rows of this tile,
#                                 channels = [kw=0 | kw=1 | kw=2] views
#   wb_ref : (3*Cin, 3*Cout)      columns = [kh=0 | kh=1 | kh=2] weights
#   r = xs @ wb                   ONE MXU matmul (no accumulator RMW)
#   out[i,j] = r[(i+0)*w+j, 0:C] + r[(i+1)*w+j, C:2C] + r[(i+2)*w+j, 2C:3C]
# Row shifts are multiples of w (>= 8) and column shifts multiples of 128,
# so the three epilogue slices are sublane/lane aligned.
# ---------------------------------------------------------------------------
def _bottleneck_head_kernel(xs_ref, wb_ref, bb_ref, wh_ref, bh_ref,
                            bottle_ref, head_ref, *, m, w, out_c, slope):
    r = jnp.dot(xs_ref[...], wb_ref[...],
                preferred_element_type=jnp.float32)      # ((th+2)*w, 3*out_c)
    y = (r[0:m, 0:out_c]
         + r[w:w + m, out_c:2 * out_c]
         + r[2 * w:2 * w + m, 2 * out_c:3 * out_c])
    y = y + bb_ref[...]                                  # folded BN shift
    y = jnp.maximum(y, y * slope)                        # leaky_relu(0.01)
    bottle_ref[...] = y.astype(bottle_ref.dtype)         # bf16 writeback
    # Fused 1x1 head conv (nn.Dropout2d(0.1) is identity in eval mode).
    z = jnp.dot(y.astype(wh_ref.dtype), wh_ref[...],
                preferred_element_type=jnp.float32) + bh_ref[...]
    head_ref[...] = z.astype(head_ref.dtype)


# ---------------------------------------------------------------------------
# Tiny separable spatial operators (adaptive avg-pool / bilinear upsample):
# K <= 16 contractions, done with plain einsum (Pallas would be pure padding
# and launch overhead here).
# ---------------------------------------------------------------------------
def _adaptive_pool_matrix(out_size, in_size):
    """1-D factor of nn.AdaptiveAvgPool2d bin averaging."""
    m = np.zeros((out_size, in_size), np.float32)
    for i in range(out_size):
        start = (i * in_size) // out_size
        end = int(math.ceil((i + 1) * in_size / out_size))
        m[i, start:end] = 1.0 / (end - start)
    return jnp.asarray(m)


def _bilinear_matrix(out_size, in_size):
    """1-D factor of F.interpolate(mode='bilinear', align_corners=True)."""
    m = np.zeros((out_size, in_size), np.float32)
    if in_size == 1:
        m[:, 0] = 1.0
    else:
        for i in range(out_size):
            src = i * (in_size - 1) / (out_size - 1) if out_size > 1 else 0.0
            lo = min(int(math.floor(src)), in_size - 2)
            frac = src - lo
            m[i, lo] += 1.0 - frac
            m[i, lo + 1] += frac
    return jnp.asarray(m)


# ---------------------------------------------------------------------------
# Parameters (deterministic synthetic init, shapes from the module __init__).
# layers == [2, 2, 2, 2]  =>  PSPModule(512, 128), head: Conv2d(128, nc, 1x1).
# All constant transforms (BN fold, transpose, pad, bf16 cast) happen here,
# once, instead of per forward call.
# ---------------------------------------------------------------------------
def _bn_fold(gamma, beta, mean, var):
    scale = gamma / jnp.sqrt(var + EPS)
    shift = beta - mean * scale
    return scale, shift


def init_params(key, features=512, out_features=128, num_classes=19,
                sizes=(1, 2, 3, 6)):
    keys = iter(jax.random.split(key, 64))
    params = {"sizes": tuple(sizes), "out_features": out_features,
              "num_classes": num_classes}

    # PSP stage 1x1 convs (bias=False) + InPlaceABNSync: BN scale folded into
    # the weight columns; all 4 stages concatenated along N for one launch.
    ws, shifts = [], []
    for _ in sizes:
        w = jax.random.normal(next(keys), (out_features, features),
                              jnp.float32) * 0.02        # torch (Cout, Cin)
        gamma = 1.0 + 0.1 * jax.random.normal(next(keys), (out_features,))
        beta = 0.1 * jax.random.normal(next(keys), (out_features,))
        scale, shift = _bn_fold(gamma, beta,
                                jnp.zeros((out_features,), jnp.float32),
                                jnp.ones((out_features,), jnp.float32))
        ws.append(w.T * scale[None, :])                   # (Cin, Cout)
        shifts.append(shift)
    params["stage_w"] = jnp.concatenate(ws, axis=1).astype(jnp.bfloat16)
    params["stage_b"] = jnp.concatenate(shifts)[None, :].astype(jnp.float32)

    # Bottleneck 3x3 conv (bias=False) + InPlaceABNSync, BN folded.
    # Stored as (3*Cin, 3*Cout):  [kw*Cin + ci, kh*Cout + co] = W[co,ci,kh,kw]
    # so the whole conv is one matmul with kw folded into K and kh into N.
    cat_c = features + len(sizes) * out_features
    wb = jax.random.normal(next(keys), (out_features, cat_c, 3, 3),
                           jnp.float32) * 0.01            # torch (Cout,Cin,3,3)
    gamma = 1.0 + 0.1 * jax.random.normal(next(keys), (out_features,))
    beta = 0.1 * jax.random.normal(next(keys), (out_features,))
    scale, shift = _bn_fold(gamma, beta,
                            jnp.zeros((out_features,), jnp.float32),
                            jnp.ones((out_features,), jnp.float32))
    wb = jnp.transpose(wb, (3, 1, 2, 0))                  # (kw, Cin, kh, Cout)
    wb = wb * scale[None, None, None, :]
    params["bneck_w"] = wb.reshape(3 * cat_c,
                                   3 * out_features).astype(jnp.bfloat16)
    params["bneck_b"] = shift[None, :].astype(jnp.float32)

    # Head: Conv2d(out_features, num_classes, 1x1, bias=True); class dim
    # padded to a lane-dense 128 here, sliced back to num_classes at the end.
    ncls_pad = _round_up(num_classes, 128)
    wh = jax.random.normal(next(keys), (num_classes, out_features),
                           jnp.float32) * 0.02
    bh = 0.01 * jax.random.normal(next(keys), (num_classes,), jnp.float32)
    params["head_w"] = (jnp.zeros((out_features, ncls_pad), jnp.float32)
                        .at[:, :num_classes].set(wh.T).astype(jnp.bfloat16))
    params["head_b"] = (jnp.zeros((1, ncls_pad), jnp.float32)
                        .at[0, :num_classes].set(bh))
    return params


# ---------------------------------------------------------------------------
# Modules
# ---------------------------------------------------------------------------
def psp_and_head(params, feats_nchw, *, row_tile=4):
    """PSPModule (4 pooled stages + 3x3 bottleneck) with the 1x1 head fused
    into the bottleneck kernel.  Returns NHWC (bottleneck bf16, head f32,
    classes padded to 128).  `row_tile` tiles H (2-row halo per tile) so the
    grid has enough steps per TensorCore; raise it for larger feature maps."""
    n, c, h, w = feats_nchw.shape
    sizes = params["sizes"]
    out_c = params["out_features"]
    x = jnp.transpose(feats_nchw, (0, 2, 3, 1)).astype(jnp.float32)  # NHWC

    # --- adaptive average pooling: tiny separable contractions (einsum) ----
    pooled_rows, offsets, off = [], [], 0
    for s in sizes:
        ph = _adaptive_pool_matrix(s, h)
        pw = _adaptive_pool_matrix(s, w)
        p = jnp.einsum("iy,jx,byxc->bijc", ph, pw, x)      # (n, s, s, c)
        pooled_rows.append(p.reshape(n * s * s, c))
        offsets.append(off)
        off += n * s * s
    total_rows = off
    m_stage = _round_up(total_rows, 8)
    lhs = jnp.concatenate(pooled_rows, axis=0)
    lhs = jnp.pad(lhs, ((0, m_stage - total_rows), (0, 0))).astype(jnp.bfloat16)

    # --- all four 1x1 stage convs + BN + leaky-ReLU: ONE Pallas launch -----
    y_all = mm_bias_act(lhs, params["stage_w"], params["stage_b"],
                        slope=LEAKY_SLOPE)                 # (m_stage, 4*out_c)

    # --- bilinear upsample (align_corners=True) back to (h, w): einsum -----
    priors = []
    for idx, s in enumerate(sizes):
        blk = y_all[offsets[idx]:offsets[idx] + n * s * s,
                    idx * out_c:(idx + 1) * out_c].reshape(n, s, s, out_c)
        uh = _bilinear_matrix(h, s)
        uw = _bilinear_matrix(w, s)
        priors.append(jnp.einsum("yi,xj,bijc->byxc", uh, uw, blk))
    priors.append(x)                   # torch.cat([*stages, feats], dim=1)

    cat = jnp.concatenate(priors, axis=-1).astype(jnp.bfloat16)  # (n,h,w,Cin)
    cin = cat.shape[-1]

    # --- implicit im2col for the 3x3 conv -----------------------------------
    # kw folded into channels (K), then H tiled into row blocks with a 2-row
    # halo so the Pallas grid is (batch, n_tiles).
    cat_pad = jnp.pad(cat, ((0, 0), (1, 1), (1, 1), (0, 0)))     # zero pad=1
    xcol = jnp.concatenate([cat_pad[:, :, kw:kw + w, :] for kw in range(3)],
                           axis=-1)                        # (n, h+2, w, 3*cin)
    th = row_tile if (row_tile is not None and 0 < row_tile < h
                      and h % row_tile == 0) else h
    nt = h // th
    tiles = jnp.stack([xcol[:, r * th:r * th + th + 2] for r in range(nt)],
                      axis=1)                              # (n,nt,th+2,w,3cin)
    kdim = 3 * cin
    m_pad_rows = (th + 2) * w
    m_rows = th * w
    xs = tiles.reshape(n, nt, m_pad_rows, kdim)

    ncls_pad = params["head_w"].shape[1]
    ndim = 3 * out_c

    # Per-step VMEM footprint (double-buffered inputs/outputs + intermediates)
    # with headroom, clamped so tile choices stay portable across 64 MiB (v7x)
    # and 128 MiB (v5e/v6e) parts.
    vmem_bytes = int(
        2 * m_pad_rows * kdim * 2          # xs block, bf16, 2 buffers
        + 2 * kdim * ndim * 2              # bneck_w (constant index; the
        + 2 * out_c * ncls_pad * 2         #   pipeliner does not re-DMA it)
        + 2 * m_rows * out_c * 2           # bottle out, bf16, 2 buffers
        + 2 * m_rows * ncls_pad * 4        # head out, f32, 2 buffers
        + m_pad_rows * ndim * 4            # matmul result
        + 2 * m_rows * max(out_c, ncls_pad) * 4   # epilogue temporaries
        + (2 << 20))                       # slack
    vmem_bytes = min(max(vmem_bytes, 16 << 20), 64 << 20)

    bottle, head_pad = pl.pallas_call(
        functools.partial(_bottleneck_head_kernel, m=m_rows, w=w,
                          out_c=out_c, slope=LEAKY_SLOPE),
        out_shape=(
            jax.ShapeDtypeStruct((n, h * w, out_c), jnp.bfloat16),
            jax.ShapeDtypeStruct((n, h * w, ncls_pad), jnp.float32),
        ),
        grid=(n, nt),
        in_specs=[
            pl.BlockSpec((None, None, m_pad_rows, kdim),
                         lambda b, r: (b, r, 0, 0)),
            pl.BlockSpec((kdim, ndim), lambda b, r: (0, 0)),
            pl.BlockSpec((1, out_c), lambda b, r: (0, 0)),
            pl.BlockSpec((out_c, ncls_pad), lambda b, r: (0, 0)),
            pl.BlockSpec((1, ncls_pad), lambda b, r: (0, 0)),
        ],
        out_specs=[
            pl.BlockSpec((None, m_rows, out_c), lambda b, r: (b, r, 0)),
            pl.BlockSpec((None, m_rows, ncls_pad), lambda b, r: (b, r, 0)),
        ],
        compiler_params=pltpu.CompilerParams(
            dimension_semantics=("parallel", "parallel"),
            vmem_limit_bytes=vmem_bytes),
    )(xs, params["bneck_w"], params["bneck_b"],
      params["head_w"], params["head_b"])

    bottle = bottle.reshape(n, h, w, out_c)
    head_pad = head_pad.reshape(n, h, w, ncls_pad)
    return bottle, head_pad


def head(params, x_nchw):
    """Standalone 1x1 head (used only for feat_layer == 'last')."""
    n, c, h, w = x_nchw.shape
    x = jnp.transpose(x_nchw, (0, 2, 3, 1)).reshape(n * h * w, c)
    y = mm_bias_act(x.astype(jnp.bfloat16), params["head_w"],
                    params["head_b"], slope=None, tm=256)
    y = y.reshape(n, h, w, -1)
    return jnp.transpose(y, (0, 3, 1, 2))[:, :params["num_classes"]]


def resnet_forward(params, x=None, feats=None, feat_layer="last"):
    """Mirrors ResNet.forward (pspnet.py)."""
    if feats is not None:
        x_dsn = None
        if feat_layer == "last":
            x_feat = None
            x_feat_after_psp = feats
            x_out = head(params, feats)
        else:
            x_feat = feats
            bottle_nhwc, head_nhwc = psp_and_head(params, feats)
            x_feat_after_psp = jnp.transpose(
                bottle_nhwc, (0, 3, 1, 2)).astype(jnp.float32)
            x_out = jnp.transpose(
                head_nhwc, (0, 3, 1, 2))[:, :params["num_classes"]]
    else:
        # TODO(synk): backbone path (layer0..layer4 + dsn) needs the external
        # resnet18/resnet101 definitions that are not part of this module.
        raise NotImplementedError("backbone path not implemented")
    return [x_out, x_dsn, x_feat, x_feat_after_psp]


# ---------------------------------------------------------------------------
if __name__ == "__main__":
    key = jax.random.PRNGKey(0)
    pkey, dkey = jax.random.split(key)

    features, out_features, num_classes = 512, 128, 19
    H = W = 16
    params = init_params(pkey, features, out_features, num_classes)

    # feats: layer4 output of the [2,2,2,2] variant -> (N, 512, H, W), NCHW.
    feats = jax.random.normal(dkey, (2, features, H, W), jnp.float32)

    outs = resnet_forward(params, x=None, feats=feats, feat_layer="psp")
    x_out, x_dsn, x_feat, x_feat_after_psp = outs

    jax.block_until_ready(x_out)
    jax.block_until_ready(x_feat_after_psp)

    assert x_out.shape == (2, num_classes, H, W)
    assert x_feat_after_psp.shape == (2, out_features, H, W)
    assert x_dsn is None and x_feat is feats
    assert bool(jnp.all(jnp.isfinite(x_out)))
    assert bool(jnp.all(jnp.isfinite(x_feat_after_psp)))

    print("KERNEL_OK")
</pallas_src>

<mosaic_0001>
module attributes {stable_mosaic.version = 11 : i64} {
  func.func @_mm_bias_act_kernel(%arg0: i32, %arg1: memref<104x512xbf16, #tpu.memory_space<vmem>>, %arg2: memref<512x512xbf16, #tpu.memory_space<vmem>>, %arg3: memref<1x512xf32, #tpu.memory_space<vmem>>, %arg4: memref<104x512xf32, #tpu.memory_space<vmem>>) attributes {dimension_semantics = [#tpu.dimension_semantics<parallel>], iteration_bounds = array<i64: 1>, scalar_prefetch = 0 : i64, scratch_operands = 0 : i64, tpu.core_type = #tpu.core_type<tc>, window_params = [{transform_indices = @transform_0, window_bounds = array<i64: 104, 512>}, {pipeline_mode = #tpu.pipeline_mode<synchronous>, transform_indices = @transform_1, window_bounds = array<i64: 512, 512>}, {pipeline_mode = #tpu.pipeline_mode<synchronous>, transform_indices = @transform_2, window_bounds = array<i64: 1, 512>}, {transform_indices = @transform_3, window_bounds = array<i64: 104, 512>}]} {
    %c0 = arith.constant 0 : index
    %c0_0 = arith.constant 0 : index
    %0 = vector.load %arg1[%c0, %c0_0] : memref<104x512xbf16, #tpu.memory_space<vmem>>, vector<104x512xbf16>
    %c0_1 = arith.constant 0 : index
    %c0_2 = arith.constant 0 : index
    %1 = vector.load %arg2[%c0_1, %c0_2] : memref<512x512xbf16, #tpu.memory_space<vmem>>, vector<512x512xbf16>
    %cst = arith.constant dense<0.000000e+00> : vector<104x512xf32>
    %2 = tpu.matmul %0, %1, %cst {dimension_numbers = #tpu.dot_dimension_numbers<[1], [0], [0], [1], [0, 0, 1, 1], [], []>} : vector<104x512xbf16>, vector<512x512xbf16>, vector<104x512xf32> -> vector<104x512xf32>
    %c0_3 = arith.constant 0 : index
    %c0_4 = arith.constant 0 : index
    %3 = vector.load %arg3[%c0_3, %c0_4] : memref<1x512xf32, #tpu.memory_space<vmem>>, vector<1x512xf32>
    %4 = vector.broadcast %3 : vector<1x512xf32> to vector<104x512xf32>
    %5 = arith.addf %2, %4 : vector<104x512xf32>
    %cst_5 = arith.constant 0.00999999977 : f32
    %6 = vector.broadcast %cst_5 : f32 to vector<104x512xf32>
    %7 = arith.mulf %5, %6 : vector<104x512xf32>
    %8 = arith.maximumf %5, %7 : vector<104x512xf32>
    %c0_6 = arith.constant 0 : index
    %c0_7 = arith.constant 0 : index
    %9 = vector.load %arg4[%c0_6, %c0_7] : memref<104x512xf32, #tpu.memory_space<vmem>>, vector<104x512xf32>
    tpu.vector_store %arg4[%c0_6, %c0_7], %8 {strides = array<i32>} : memref<104x512xf32, #tpu.memory_space<vmem>>, vector<104x512xf32>,
    return
  }
  func.func @transform_0(%arg0: i32) -> (i32, i32) {
    %c0_i32 = arith.constant 0 : i32
    %c0_i32_0 = arith.constant 0 : i32
    return %arg0, %c0_i32 : i32, i32
  }
  func.func @transform_1(%arg0: i32) -> (i32, i32) {
    %c0_i32 = arith.constant 0 : i32
    %c0_i32_0 = arith.constant 0 : i32
    %c0_i32_1 = arith.constant 0 : i32
    return %c0_i32, %c0_i32_0 : i32, i32
  }
  func.func @transform_2(%arg0: i32) -> (i32, i32) {
    %c0_i32 = arith.constant 0 : i32
    %c0_i32_0 = arith.constant 0 : i32
    %c0_i32_1 = arith.constant 0 : i32
    return %c0_i32, %c0_i32_0 : i32, i32
  }
  func.func @transform_3(%arg0: i32) -> (i32, i32) {
    %c0_i32 = arith.constant 0 : i32
    %c0_i32_0 = arith.constant 0 : i32
    return %arg0, %c0_i32 : i32, i32
  }
}

</mosaic_0001>

<bundles_post_ra>
// kernel: tpu_custom_call.1
= control target key start
LH: loop header
LB: loop body
LE: loop exit
PB: predicated region body
PF: predicated region fallthrough
CT: control target
= control target key end

     0   :  { %8 = vsyncpa [#allocation3], 0  ;;  %s2272_s0 = inlined_call_operand.hbm [shape: bf16[104,512], index: 0, kind: input, shape index: {}]   ;;  %s2273_s1 = inlined_call_operand.hbm [shape: bf16[512,512], index: 1, kind: input, shape index: {}]   ;;  %s2274_s2 = inlined_call_operand.vmem [shape: f32[1,512], index: 2, kind: input, shape index: {}]   ;;  %s2275_s3 = inlined_call_operand.hbm [shape: f32[104,512], index: 3, kind: output, shape index: {}]  }
   0x1   :  { %9 = vsyncpa [#allocation6], 0 }
   0x2   :  { %10 = vsyncpa [#allocation4], 0  ;;  %s2146_s12 = smov [#allocation2]   ;;  %s2074_s16 = scalar_lea.hbm %s2272_s0, 3328 }
   0x3   :  { %s16_s13 = sshll.u32 %s2146_s12, 4  ;;  %p2075_p0 = scmp.ne.s32.totalorder %s2272_s0, %s2074_s16  ;;  %s17_s13 = int_to_ptr.vmem [resolvable:$true] %s16_s13 }
   0x4   :  { %p2078_p1 = scmp.lt.u32.totalorder %s2074_s16, %s2272_s0 }
   0x6   :  { %p2080_p2 = pnand %p2078_p1, %p2075_p0 }
   0x8   :  { %2083 = shalt.err (!%p2080_p2)
}
   0x9   :  { %s2084_s21 = scalar_lea.vmem %s17_s13, 3328  ;;  %p2089_p4 = scmp.lt.s32.totalorder %s17_s13, %s17_s13 }
   0xa   :  { %p2085_p3 = scmp.ne.s32.totalorder %s17_s13, %s2084_s21  ;;  %p2090_p5 = scmp.lt.s32.totalorder %s2084_s21, %s2084_s21 }
   0xc   :  { %p2091_p6 = por %p2090_p5, %p2089_p4 }
   0xe   :  { %p2092_p7 = pnand %p2091_p6, %p2085_p3 }
  0x10   :  { %2095 = shalt.err (!%p2092_p7)
}
  0x11   :  { %s2147_s22 = smov 256   ;;  %s2148_s23 = smov 16  }
  0x12   :  { %22 = dma.hbm_to_vmem [thread:$0]  %s2272_s0, 3328, %s17_s13, [#allocation3], %s2147_s22, %s2147_s22, %s2148_s23  }
  0x13   :  { %s2149_s26 = smov [#allocation5]   ;;  %s2096_s30 = scalar_lea.hbm %s2273_s1, 16384 }
  0x14   :  { %s28_s27 = sshll.u32 %s2149_s26, 4  ;;  %p2097_p8 = scmp.ne.s32.totalorder %s2273_s1, %s2096_s30  ;;  %s29_s27 = int_to_ptr.vmem [resolvable:$true] %s28_s27 }
  0x15   :  { %p2100_p9 = scmp.lt.u32.totalorder %s2096_s30, %s2273_s1 }
  0x17   :  { %p2102_p10 = pnand %p2100_p9, %p2097_p8 }
  0x19   :  { %2105 = shalt.err (!%p2102_p10)
}
  0x1a   :  { %s2106_s8 = scalar_lea.vmem %s29_s27, 16384  ;;  %p2111_p12 = scmp.lt.s32.totalorder %s29_s27, %s29_s27 }
  0x1b   :  { %p2107_p11 = scmp.ne.s32.totalorder %s29_s27, %s2106_s8  ;;  %p2112_p13 = scmp.lt.s32.totalorder %s2106_s8, %s2106_s8 }
  0x1d   :  { %p2113_p0 = por %p2112_p13, %p2111_p12 }
  0x1f   :  { %p2114_p1 = pnand %p2113_p0, %p2107_p11 }
  0x21   :  { %2117 = shalt.err (!%p2114_p1)
}
  0x22   :  { %34 = dma.hbm_to_vmem [thread:$0]  %s2273_s1, 16384, %s29_s27, [#allocation6], %s2147_s22, %s2147_s22, %s2148_s23  }
  0x23   :  { %2140 = dma.done.wait [#allocation3], 3328  }
  0x24   :  { %2141 = vsyncadd [#allocation3], 4294963968 }
  0x25   :  { %2142 = dma.done.wait [#allocation6], 16384  }
  0x26   :  { %2143 = vsyncadd [#allocation6], 4294950912  ;;  %v1842_v0 = vld [vmem:[#allocation5 + $0x4] ss:$16 sps:$4 sm:$0xff]   ;;  %v1844_v1 = vld [vmem:[#allocation5 + $0xc] ss:$16 sps:$4 sm:$0xff]  }
  0x27   :  { %993 = vmatprep.subr.bf16.mxu0 %v1842_v0  ;;  %v1846_v2 = vld [vmem:[#allocation5] ss:$16 sps:$4 sm:$0xff]   ;;  %v1847_v3 = vld [vmem:[#allocation5 + $0x8] ss:$16 sps:$4 sm:$0xff]   ;;  %1195 = vmatprep.subr.bf16.mxu1 %v1844_v1  ;;  %v1848_v4 = vld [vmem:[#allocation5 + $0x24] ss:$16 sps:$4 sm:$0xff]  }
  0x28   :  { %994 = vmatpush1.bf16.msra.mxu0 %v1846_v2  ;;  %1196 = vmatpush1.bf16.msra.mxu1 %v1847_v3  ;;  %v1850_v5 = vld [vmem:[#allocation5 + $0x2c] ss:$16 sps:$4 sm:$0xff]   ;;  %v1852_v6 = vld [vmem:[#allocation5 + $0x20] ss:$16 sps:$4 sm:$0xff]   ;;  %v1853_v7 = vld [vmem:[#allocation5 + $0x28] ss:$16 sps:$4 sm:$0xff]  }
  0x29   :  { %995 = vmatprep.subr.bf16.mxu0 %v1848_v4  ;;  %1197 = vmatprep.subr.bf16.mxu1 %v1850_v5  ;;  %v1854_v8 = vld [vmem:[#allocation5 + $0x44] ss:$16 sps:$4 sm:$0xff]   ;;  %v1856_v9 = vld [vmem:[#allocation5 + $0x4c] ss:$16 sps:$4 sm:$0xff]   ;;  %v1858_v10 = vld [vmem:[#allocation5 + $0x40] ss:$16 sps:$4 sm:$0xff]  }
  0x2a   :  { %v1859_v11 = vld [vmem:[#allocation5 + $0x48] ss:$16 sps:$4 sm:$0xff]   ;;  %v1860_v12 = vld [vmem:[#allocation5 + $0x64] ss:$16 sps:$4 sm:$0xff]   ;;  %v1862_v13 = vld [vmem:[#allocation5 + $0x6c] ss:$16 sps:$4 sm:$0xff]  }
  0x2b   :  { %v1864_v14 = vld [vmem:[#allocation5 + $0x60] ss:$16 sps:$4 sm:$0xff]   ;;  %v1865_v15 = vld [vmem:[#allocation5 + $0x68] ss:$16 sps:$4 sm:$0xff]   ;;  %v1866_v16 = vld [vmem:[#allocation5 + $0x84] ss:$16 sps:$4 sm:$0xff]  }
  0x2c   :  { %996 = vmatpush1.bf16.msra.mxu0 %v1852_v6  ;;  %1198 = vmatpush1.bf16.msra.mxu1 %v1853_v7  ;;  %v1868_v17 = vld [vmem:[#allocation5 + $0x8c] ss:$16 sps:$4 sm:$0xff]   ;;  %v1870_v18 = vld [vmem:[#allocation5 + $0x80] ss:$16 sps:$4 sm:$0xff]   ;;  %v1871_v19 = vld [vmem:[#allocation5 + $0x88] ss:$16 sps:$4 sm:$0xff]  }
  0x2d   :  { %997 = vmatprep.subr.bf16.mxu0 %v1854_v8  ;;  %1199 = vmatprep.subr.bf16.mxu1 %v1856_v9  ;;  %v1872_v20 = vld [vmem:[#allocation5 + $0xa4] ss:$16 sps:$4 sm:$0xff]   ;;  %v1874_v21 = vld [vmem:[#allocation5 + $0xac] ss:$16 sps:$4 sm:$0xff]   ;;  %v1876_v22 = vld [vmem:[#allocation5 + $0xa0] ss:$16 sps:$4 sm:$0xff]  }
  0x2e   :  { %v1877_v23 = vld [vmem:[#allocation5 + $0xa8] ss:$16 sps:$4 sm:$0xff]   ;;  %v1878_v24 = vld [vmem:[#allocation5 + $0xc4] ss:$16 sps:$4 sm:$0xff]   ;;  %v1880_v25 = vld [vmem:[#allocation5 + $0xcc] ss:$16 sps:$4 sm:$0xff]  }
  0x2f   :  { %v1882_v26 = vld [vmem:[#allocation5 + $0xc0] ss:$16 sps:$4 sm:$0xff]   ;;  %v1883_v27 = vld [vmem:[#allocation5 + $0xc8] ss:$16 sps:$4 sm:$0xff]   ;;  %v1884_v28 = vld [vmem:[#allocation5 + $0xe4] ss:$16 sps:$4 sm:$0xff]  }
  0x30   :  { %998 = vmatpush1.bf16.msra.mxu0 %v1858_v10  ;;  %1200 = vmatpush1.bf16.msra.mxu1 %v1859_v11  ;;  %v1886_v29 = vld [vmem:[#allocation5 + $0xec] ss:$16 sps:$4 sm:$0xff]   ;;  %v1888_v30 = vld [vmem:[#allocation5 + $0xe0] ss:$16 sps:$4 sm:$0xff]   ;;  %v1889_v31 = vld [vmem:[#allocation5 + $0xe8] ss:$16 sps:$4 sm:$0xff]  }
  0x31   :  { %999 = vmatprep.subr.bf16.mxu0 %v1860_v12  ;;  %1201 = vmatprep.subr.bf16.mxu1 %v1862_v13  ;;  %v1890_v32 = vld [vmem:[#allocation5 + $0x104] ss:$16 sps:$4 sm:$0xff]   ;;  %v1892_v33 = vld [vmem:[#allocation5 + $0x10c] ss:$16 sps:$4 sm:$0xff]   ;;  %v1894_v34 = vld [vmem:[#allocation5 + $0x100] ss:$16 sps:$4 sm:$0xff]  }
  0x32   :  { %v1895_v35 = vld [vmem:[#allocation5 + $0x108] ss:$16 sps:$4 sm:$0xff]   ;;  %v1896_v36 = vld [vmem:[#allocation5 + $0x124] ss:$16 sps:$4 sm:$0xff]   ;;  %v1898_v37 = vld [vmem:[#allocation5 + $0x12c] ss:$16 sps:$4 sm:$0xff]  }
  0x33   :  { %v1900_v38 = vld [vmem:[#allocation5 + $0x120] ss:$16 sps:$4 sm:$0xff]   ;;  %v1901_v39 = vld [vmem:[#allocation5 + $0x128] ss:$16 sps:$4 sm:$0xff]   ;;  %v1902_v40 = vld [vmem:[#allocation5 + $0x144] ss:$16 sps:$4 sm:$0xff]  }
  0x34   :  { %1000 = vmatpush1.bf16.msra.mxu0 %v1864_v14  ;;  %1202 = vmatpush1.bf16.msra.mxu1 %v1865_v15  ;;  %v1904_v41 = vld [vmem:[#allocation5 + $0x14c] ss:$16 sps:$4 sm:$0xff]   ;;  %v1906_v42 = vld [vmem:[#allocation5 + $0x140] ss:$16 sps:$4 sm:$0xff]   ;;  %v1907_v43 = vld [vmem:[#allocation5 + $0x148] ss:$16 sps:$4 sm:$0xff]  }
  0x35   :  { %1001 = vmatprep.subr.bf16.mxu0 %v1866_v16  ;;  %1203 = vmatprep.subr.bf16.mxu1 %v1868_v17  ;;  %v1908_v44 = vld [vmem:[#allocation5 + $0x164] ss:$16 sps:$4 sm:$0xff]   ;;  %v1910_v45 = vld [vmem:[#allocation5 + $0x16c] ss:$16 sps:$4 sm:$0xff]   ;;  %v1912_v46 = vld [vmem:[#allocation5 + $0x160] ss:$16 sps:$4 sm:$0xff]  }
  0x36   :  { %v1913_v47 = vld [vmem:[#allocation5 + $0x168] ss:$16 sps:$4 sm:$0xff]   ;;  %v1940_v48 = vld [vmem:[#allocation2 + $0x4] ss:$16 sps:$4 sm:$0xff]   ;;  %v1916_v50 = vld [vmem:[#allocation5 + $0x18c] ss:$16 sps:$4 sm:$0xff]  }
  0x37   :  { %v1914_v49 = vld [vmem:[#allocation5 + $0x184] ss:$16 sps:$4 sm:$0xff]   ;;  %1025 = vmatprep.mubr.bf16.mxu0 %v1940_v48  ;;  %1227 = vmatprep.mubr.bf16.mxu1 %v1940_v48  ;;  %v1918_v51 = vld [vmem:[#allocation5 + $0x180] ss:$16 sps:$4 sm:$0xff]   ;;  %v1919_v52 = vld [vmem:[#allocation5 + $0x188] ss:$16 sps:$4 sm:$0xff]  }
  0x38   :  { %1002 = vmatpush1.bf16.msra.mxu0 %v1870_v18  ;;  %1204 = vmatpush1.bf16.msra.mxu1 %v1871_v19  ;;  %v1920_v53 = vld [vmem:[#allocation5 + $0x1a4] ss:$16 sps:$4 sm:$0xff]   ;;  %v1922_v54 = vld [vmem:[#allocation5 + $0x1ac] ss:$16 sps:$4 sm:$0xff]   ;;  %v1924_v55 = vld [vmem:[#allocation5 + $0x1a0] ss:$16 sps:$4 sm:$0xff]  }
  0x39   :  { %1003 = vmatprep.subr.bf16.mxu0 %v1872_v20  ;;  %1205 = vmatprep.subr.bf16.mxu1 %v1874_v21  ;;  %v1925_v56 = vld [vmem:[#allocation5 + $0x1a8] ss:$16 sps:$4 sm:$0xff]   ;;  %v1926_v57 = vld [vmem:[#allocation5 + $0x1c4] ss:$16 sps:$4 sm:$0xff]   ;;  %v1928_v58 = vld [vmem:[#allocation5 + $0x1cc] ss:$16 sps:$4 sm:$0xff]  }
  0x3a   :  { %v1930_v59 = vld [vmem:[#allocation5 + $0x1c0] ss:$16 sps:$4 sm:$0xff]   ;;  %v1931_v60 = vld [vmem:[#allocation5 + $0x1c8] ss:$16 sps:$4 sm:$0xff]   ;;  %v1932_v61 = vld [vmem:[#allocation5 + $0x1e4] ss:$16 sps:$4 sm:$0xff]  }
  0x3b   :  { %v1934_v62 = vld [vmem:[#allocation5 + $0x1ec] ss:$16 sps:$4 sm:$0xff]   ;;  %v1936_v63 = vld [vmem:[#allocation5 + $0x1e0] ss:$16 sps:$4 sm:$0xff]   ;;  %v1937_v0 = vld [vmem:[#allocation5 + $0x1e8] ss:$16 sps:$4 sm:$0xff]  }
  0x3c   :  { %1004 = vmatpush1.bf16.msra.mxu0 %v1876_v22  ;;  %1206 = vmatpush1.bf16.msra.mxu1 %v1877_v23  ;;  %v1943_v1 = vld [vmem:[#allocation5 + $0x204] ss:$16 sps:$4 sm:$0xff]   ;;  %v1946_v2 = vld [vmem:[#allocation5 + $0x20c] ss:$16 sps:$4 sm:$0xff]   ;;  %v1938_v3 = vld [vmem:[#allocation2] ss:$16 sps:$4 sm:$0xff]  }
  0x3d   :  { %1005 = vmatprep.subr.bf16.mxu0 %v1878_v24  ;;  %1207 = vmatprep.subr.bf16.mxu1 %v1880_v25  ;;  %v1941_v4 = vld [vmem:[#allocation5 + $0x200] ss:$16 sps:$4 sm:$0xff]   ;;  %v1944_v5 = vld [vmem:[#allocation5 + $0x208] ss:$16 sps:$4 sm:$0xff]   ;;  %v1949_v6 = vld [vmem:[#allocation5 + $0x224] ss:$16 sps:$4 sm:$0xff]  }
  0x3e   :  { %v1952_v7 = vld [vmem:[#allocation5 + $0x22c] ss:$16 sps:$4 sm:$0xff]   ;;  %v1965_v8 = vld [vmem:[#allocation2 + $0x24] ss:$16 sps:$4 sm:$0xff]   ;;  %v1947_v9 = vld [vmem:[#allocation5 + $0x220] ss:$16 sps:$4 sm:$0xff]  }
  0x3f   :  { %v1950_v10 = vld [vmem:[#allocation5 + $0x228] ss:$16 sps:$4 sm:$0xff]   ;;  %v1955_v11 = vld [vmem:[#allocation5 + $0x244] ss:$16 sps:$4 sm:$0xff]   ;;  %v1958_v12 = vld [vmem:[#allocation5 + $0x24c] ss:$16 sps:$4 sm:$0xff]  }
  0x40   :  { %1006 = vmatpush1.bf16.msra.mxu0 %v1882_v26  ;;  %1208 = vmatpush1.bf16.msra.mxu1 %v1883_v27  ;;  %v1953_v13 = vld [vmem:[#allocation5 + $0x240] ss:$16 sps:$4 sm:$0xff]   ;;  %v1956_v14 = vld [vmem:[#allocation5 + $0x248] ss:$16 sps:$4 sm:$0xff]   ;;  %v1961_v16 = vld [vmem:[#allocation5 + $0x264] ss:$16 sps:$4 sm:$0xff]  }
  0x41   :  { %1007 = vmatprep.subr.bf16.mxu0 %v1884_v28  ;;  %1209 = vmatprep.subr.bf16.mxu1 %v1886_v29  ;;  %v1967_v15 = vld [vmem:[#allocation2 + $0x20] ss:$16 sps:$4 sm:$0xff]   ;;  %v1964_v17 = vld [vmem:[#allocation5 + $0x26c] ss:$16 sps:$4 sm:$0xff]   ;;  %v1980_v18 = vld [vmem:[#allocation2 + $0x44] ss:$16 sps:$4 sm:$0xff]  }
  0x42   :  { %v1959_v19 = vld [vmem:[#allocation5 + $0x260] ss:$16 sps:$4 sm:$0xff]   ;;  %v1962_v20 = vld [vmem:[#allocation5 + $0x268] ss:$16 sps:$4 sm:$0xff]   ;;  %v1970_v21 = vld [vmem:[#allocation5 + $0x284] ss:$16 sps:$4 sm:$0xff]  }
  0x43   :  { %v1973_v22 = vld [vmem:[#allocation5 + $0x28c] ss:$16 sps:$4 sm:$0xff]   ;;  %v1968_v23 = vld [vmem:[#allocation5 + $0x280] ss:$16 sps:$4 sm:$0xff]   ;;  %v1971_v24 = vld [vmem:[#allocation5 + $0x288] ss:$16 sps:$4 sm:$0xff]  }
  0x44   :  { %1008 = vmatpush1.bf16.msra.mxu0 %v1888_v30  ;;  %1210 = vmatpush1.bf16.msra.mxu1 %v1889_v31  ;;  %v1982_v25 = vld [vmem:[#allocation2 + $0x40] ss:$16 sps:$4 sm:$0xff]   ;;  %v1976_v26 = vld [vmem:[#allocation5 + $0x2a4] ss:$16 sps:$4 sm:$0xff]   ;;  %v1979_v27 = vld [vmem:[#allocation5 + $0x2ac] ss:$16 sps:$4 sm:$0xff]  }
  0x45   :  { %1009 = vmatprep.subr.bf16.mxu0 %v1890_v32  ;;  %1211 = vmatprep.subr.bf16.mxu1 %v1892_v33  ;;  %v1995_v28 = vld [vmem:[#allocation2 + $0x64] ss:$16 sps:$4 sm:$0xff]   ;;  %v1974_v29 = vld [vmem:[#allocation5 + $0x2a0] ss:$16 sps:$4 sm:$0xff]   ;;  %v1977_v30 = vld [vmem:[#allocation5 + $0x2a8] ss:$16 sps:$4 sm:$0xff]  }
  0x46   :  { %v1985_v31 = vld [vmem:[#allocation5 + $0x2c4] ss:$16 sps:$4 sm:$0xff]   ;;  %v1988_v32 = vld [vmem:[#allocation5 + $0x2cc] ss:$16 sps:$4 sm:$0xff]   ;;  %v1983_v33 = vld [vmem:[#allocation5 + $0x2c0] ss:$16 sps:$4 sm:$0xff]  }
  0x47   :  { %v2025_v48 = vld [vmem:[#allocation2 + $0xa4] ss:$16 sps:$4 sm:$0xff]  }
  0x48   :  { %1010 = vmatpush1.bf16.msra.mxu0 %v1894_v34  ;;  %1212 = vmatpush1.bf16.msra.mxu1 %v1895_v35  ;;  %v1997_v34 = vld [vmem:[#allocation2 + $0x60] ss:$16 sps:$4 sm:$0xff]   ;;  %v1986_v35 = vld [vmem:[#allocation5 + $0x2c8] ss:$16 sps:$4 sm:$0xff]  }
  0x49   :  { %1011 = vmatprep.subr.bf16.mxu0 %v1896_v36  ;;  %1213 = vmatprep.subr.bf16.mxu1 %v1898_v37  ;;  %v1991_v36 = vld [vmem:[#allocation5 + $0x2e4] ss:$16 sps:$4 sm:$0xff]   ;;  %v1994_v37 = vld [vmem:[#allocation5 + $0x2ec] ss:$16 sps:$4 sm:$0xff]  }
  0x4c   :  { %1012 = vmatpush1.bf16.msra.mxu0 %v1900_v38  ;;  %1214 = vmatpush1.bf16.msra.mxu1 %v1901_v39  ;;  %v2010_v38 = vld [vmem:[#allocation2 + $0x84] ss:$16 sps:$4 sm:$0xff]   ;;  %v1989_v39 = vld [vmem:[#allocation5 + $0x2e0] ss:$16 sps:$4 sm:$0xff]  }
  0x4d   :  { %1013 = vmatprep.subr.bf16.mxu0 %v1902_v40  ;;  %1215 = vmatprep.subr.bf16.mxu1 %v1904_v41  ;;  %v1992_v40 = vld [vmem:[#allocation5 + $0x2e8] ss:$16 sps:$4 sm:$0xff]   ;;  %v2000_v41 = vld [vmem:[#allocation5 + $0x304] ss:$16 sps:$4 sm:$0xff]  }
  0x50   :  { %1014 = vmatpush1.bf16.msra.mxu0 %v1906_v42  ;;  %1216 = vmatpush1.bf16.msra.mxu1 %v1907_v43  ;;  %v2003_v42 = vld [vmem:[#allocation5 + $0x30c] ss:$16 sps:$4 sm:$0xff]   ;;  %v1998_v43 = vld [vmem:[#allocation5 + $0x300] ss:$16 sps:$4 sm:$0xff]  }
  0x51   :  { %1015 = vmatprep.subr.bf16.mxu0 %v1908_v44  ;;  %1217 = vmatprep.subr.bf16.mxu1 %v1910_v45  ;;  %v2012_v44 = vld [vmem:[#allocation2 + $0x80] ss:$16 sps:$4 sm:$0xff]   ;;  %v2001_v45 = vld [vmem:[#allocation5 + $0x308] ss:$16 sps:$4 sm:$0xff]  }
  0x54   :  { %1016 = vmatpush1.bf16.msra.mxu0 %v1912_v46  ;;  %1218 = vmatpush1.bf16.msra.mxu1 %v1913_v47  ;;  %v2006_v46 = vld [vmem:[#allocation5 + $0x324] ss:$16 sps:$4 sm:$0xff]   ;;  %v2009_v47 = vld [vmem:[#allocation5 + $0x32c] ss:$16 sps:$4 sm:$0xff]  }
  0x55   :  { %1017 = vmatprep.subr.bf16.mxu0 %v1914_v49  ;;  %1219 = vmatprep.subr.bf16.mxu1 %v1916_v50  ;;  %v2004_v49 = vld [vmem:[#allocation5 + $0x320] ss:$16 sps:$4 sm:$0xff]   ;;  %v2007_v50 = vld [vmem:[#allocation5 + $0x328] ss:$16 sps:$4 sm:$0xff]  }
  0x58   :  { %1018 = vmatpush1.bf16.msra.mxu0 %v1918_v51  ;;  %1220 = vmatpush1.bf16.msra.mxu1 %v1919_v52  ;;  %v2015_v51 = vld [vmem:[#allocation5 + $0x344] ss:$16 sps:$4 sm:$0xff]   ;;  %v2018_v52 = vld [vmem:[#allocation5 + $0x34c] ss:$16 sps:$4 sm:$0xff]  }
  0x59   :  { %1019 = vmatprep.subr.bf16.mxu0 %v1920_v53  ;;  %1221 = vmatprep.subr.bf16.mxu1 %v1922_v54  ;;  %v2027_v53 = vld [vmem:[#allocation2 + $0xa0] ss:$16 sps:$4 sm:$0xff]  }
  0x5a   :  { %v67_v54 = vld [vmem:[#allocation2 + $0xc0] sm:$0xff] }
  0x5c   :  { %1020 = vmatpush1.bf16.msra.mxu0 %v1924_v55  ;;  %1222 = vmatpush1.bf16.msra.mxu1 %v1925_v56  ;;  %v2013_v55 = vld [vmem:[#allocation5 + $0x340] ss:$16 sps:$4 sm:$0xff]   ;;  %v2016_v56 = vld [vmem:[#allocation5 + $0x348] ss:$16 sps:$4 sm:$0xff]  }
  0x5d   :  { %1021 = vmatprep.subr.bf16.mxu0 %v1926_v57  ;;  %1223 = vmatprep.subr.bf16.mxu1 %v1928_v58  ;;  %v2021_v57 = vld [vmem:[#allocation5 + $0x364] ss:$16 sps:$4 sm:$0xff]   ;;  %v2024_v58 = vld [vmem:[#allocation5 + $0x36c] ss:$16 sps:$4 sm:$0xff]  }
  0x60   :  { %1022 = vmatpush1.bf16.msra.mxu0 %v1930_v59  ;;  %1224 = vmatpush1.bf16.msra.mxu1 %v1931_v60  ;;  %v1596_v59 = vcombine.high %v67_v54, %v67_v54  ;;  %v2019_v60 = vld [vmem:[#allocation5 + $0x360] ss:$16 sps:$4 sm:$0xff]  }
  0x61   :  { %1023 = vmatprep.subr.bf16.mxu0 %v1932_v61  ;;  %1225 = vmatprep.subr.bf16.mxu1 %v1934_v62  ;;  %v2022_v61 = vld [vmem:[#allocation5 + $0x368] ss:$16 sps:$4 sm:$0xff]   ;;  %v2030_v62 = vld [vmem:[#allocation5 + $0x384] ss:$16 sps:$4 sm:$0xff]  }
  0x64   :  { %1024 = vmatpush1.bf16.msra.mxu0 %v1936_v63  ;;  %1226 = vmatpush1.bf16.msra.mxu1 %v1937_v0  ;;  %v2033_v63 = vld [vmem:[#allocation5 + $0x38c] ss:$16 sps:$4 sm:$0xff]   ;;  %v1595_v0 = vcombine.low %v67_v54, %v67_v54 }
  0x65   :  { %1094 = vmatprep.subr.bf16.mxu0 %v1943_v1  ;;  %1296 = vmatprep.subr.bf16.mxu1 %v1946_v2  ;;  %v2028_v1 = vld [vmem:[#allocation5 + $0x380] ss:$16 sps:$4 sm:$0xff]   ;;  %v2031_v2 = vld [vmem:[#allocation5 + $0x388] ss:$16 sps:$4 sm:$0xff]  }
  0x67   :  { %1026 = vmatmul.mubr.bf16.vlgmr.msra.gmra.mrb[0].mxu0 %v1938_v3  ;;  %1228 = vmatmul.mubr.bf16.vlgmr.msra.gmra.mrb[0].mxu1 %v1938_v3  ;;  %v2036_v3 = vld [vmem:[#allocation5 + $0x3a4] ss:$16 sps:$4 sm:$0xff]  }
  0x68   :  { %1095 = vmatpush1.bf16.msra.mxu0 %v1941_v4  ;;  %1297 = vmatpush1.bf16.msra.mxu1 %v1944_v5  ;;  %v2039_v4 = vld [vmem:[#allocation5 + $0x3ac] ss:$16 sps:$4 sm:$0xff]  }
  0x69   :  { %1096 = vmatprep.subr.bf16.mxu0 %v1949_v6  ;;  %1298 = vmatprep.subr.bf16.mxu1 %v1952_v7  ;;  %v2056_v5 = vld [vmem:[#allocation2 + $0xc] ss:$16 sps:$4 sm:$0xff]   ;;  %v2034_v6 = vld [vmem:[#allocation5 + $0x3a0] ss:$16 sps:$4 sm:$0xff]   ;;  %v2037_v7 = vld [vmem:[#allocation5 + $0x3a8] ss:$16 sps:$4 sm:$0xff]  }
  0x6a   :  { %1035 = vmatprep.mubr.bf16.mxu0 %v1965_v8  ;;  %1237 = vmatprep.mubr.bf16.mxu1 %v1965_v8  ;;  %v2044_v8 = vld [vmem:[#allocation5 + $0x3c4] ss:$16 sps:$4 sm:$0xff]  }
  0x6c   :  { %1097 = vmatpush1.bf16.msra.mxu0 %v1947_v9  ;;  %1299 = vmatpush1.bf16.msra.mxu1 %v1950_v10  ;;  %v2047_v9 = vld [vmem:[#allocation5 + $0x3cc] ss:$16 sps:$4 sm:$0xff]   ;;  %v2042_v10 = vld [vmem:[#allocation5 + $0x3c0] ss:$16 sps:$4 sm:$0xff]  }
  0x6d   :  { %1098 = vmatprep.subr.bf16.mxu0 %v1955_v11  ;;  %1300 = vmatprep.subr.bf16.mxu1 %v1958_v12  ;;  %v2045_v11 = vld [vmem:[#allocation5 + $0x3c8] ss:$16 sps:$4 sm:$0xff]   ;;  %v2050_v12 = vld [vmem:[#allocation5 + $0x3e4] ss:$16 sps:$4 sm:$0xff]  }
  0x6f   :  { %1036 = vmatmul.mubr.bf16.gmra.mrb[4].mxu0 %v1967_v15  ;;  %1238 = vmatmul.mubr.bf16.gmra.mrb[4].mxu1 %v1967_v15  ;;  %v2051_v15 = vld [vmem:[#allocation5 + $0x3e8] ss:$16 sps:$4 sm:$0xff]  }
  0x70   :  { %1099 = vmatpush1.bf16.msra.mxu0 %v1953_v13  ;;  %1301 = vmatpush1.bf16.msra.mxu1 %v1956_v14  ;;  %v2053_v13 = vld [vmem:[#allocation5 + $0x3ec] ss:$16 sps:$4 sm:$0xff]   ;;  %v2048_v14 = vld [vmem:[#allocation5 + $0x3e0] ss:$16 sps:$4 sm:$0xff]  }
  0x71   :  { %1100 = vmatprep.subr.bf16.mxu0 %v1961_v16  ;;  %1302 = vmatprep.subr.bf16.mxu1 %v1964_v17  ;;  %v2054_v16 = vld [vmem:[#allocation2 + $0x8] ss:$16 sps:$4 sm:$0xff]   ;;  %v2057_v17 = vld [vmem:[#allocation2 + $0x2c] ss:$16 sps:$4 sm:$0xff]  }
  0x72   :  { %1045 = vmatprep.mubr.bf16.mxu0 %v1980_v18  ;;  %1247 = vmatprep.mubr.bf16.mxu1 %v1980_v18  ;;  %v2059_v18 = vld [vmem:[#allocation2 + $0x28] ss:$16 sps:$4 sm:$0xff]  }
  0x74   :  { %1101 = vmatpush1.bf16.msra.mxu0 %v1959_v19  ;;  %1303 = vmatpush1.bf16.msra.mxu1 %v1962_v20  ;;  %v2060_v19 = vld [vmem:[#allocation2 + $0x4c] ss:$16 sps:$4 sm:$0xff]   ;;  %v2062_v20 = vld [vmem:[#allocation2 + $0x48] ss:$16 sps:$4 sm:$0xff]  }
  0x75   :  { %1102 = vmatprep.subr.bf16.mxu0 %v1970_v21  ;;  %1304 = vmatprep.subr.bf16.mxu1 %v1973_v22  ;;  %v2063_v21 = vld [vmem:[#allocation2 + $0x6c] ss:$16 sps:$4 sm:$0xff]   ;;  %v2065_v22 = vld [vmem:[#allocation2 + $0x68] ss:$16 sps:$4 sm:$0xff]  }
  0x77   :  { %1046 = vmatmul.mubr.bf16.gmra.mrb[8].mxu0 %v1982_v25  ;;  %1248 = vmatmul.mubr.bf16.gmra.mrb[8].mxu1 %v1982_v25  ;;  %v2069_v25 = vld [vmem:[#allocation2 + $0xac] ss:$16 sps:$4 sm:$0xff]  }
  0x78   :  { %1103 = vmatpush1.bf16.msra.mxu0 %v1968_v23  ;;  %1305 = vmatpush1.bf16.msra.mxu1 %v1971_v24  ;;  %v2066_v23 = vld [vmem:[#allocation2 + $0x8c] ss:$16 sps:$4 sm:$0xff]   ;;  %v2068_v24 = vld [vmem:[#allocation2 + $0x88] ss:$16 sps:$4 sm:$0xff]  }
  0x79   :  { %1104 = vmatprep.subr.bf16.mxu0 %v1976_v26  ;;  %1306 = vmatprep.subr.bf16.mxu1 %v1979_v27  ;;  %v68_v26 = vld [vmem:[#allocation2 + $0xc8] sm:$0xff] }
  0x7a   :  { %1055 = vmatprep.mubr.bf16.mxu0 %v1995_v28  ;;  %1257 = vmatprep.mubr.bf16.mxu1 %v1995_v28  ;;  %v2071_v27 = vld [vmem:[#allocation2 + $0xa8] ss:$16 sps:$4 sm:$0xff]   ;;  %v1598_v28 = vcombine.high %v68_v26, %v68_v26 }
  0x7c   :  { %1105 = vmatpush1.bf16.msra.mxu0 %v1974_v29  ;;  %1307 = vmatpush1.bf16.msra.mxu1 %v1977_v30  ;;  %v1597_v29 = vcombine.low %v68_v26, %v68_v26  ;;  %v199_v30 = vlaneseq }
  0x7d   :  { %1106 = vmatprep.subr.bf16.mxu0 %v1985_v31  ;;  %1308 = vmatprep.subr.bf16.mxu1 %v1988_v32 }
  0x7e   :  { %v200_v31 = vshrl.u32 %v199_v30, 7 }
  0x7f   :  { %1056 = vmatmul.mubr.bf16.gmra.mrb[12].mxu0 %v1997_v34  ;;  %1258 = vmatmul.mubr.bf16.gmra.mrb[12].mxu1 %v1997_v34  ;;  %v197_v34 = vld [vmem:[%s2274_s2] sm:$0xf]  ;;  %s2150_s2 = smov [#allocation7]  }
  0x80   :  { %1107 = vmatpush1.bf16.msra.mxu0 %v1983_v33  ;;  %1309 = vmatpush1.bf16.msra.mxu1 %v1986_v35  ;;  %v201_v32 = vsub.s32 0, %v200_v31  ;;  %v209_v33 = vsub.s32 2, %v200_v31  ;;  %v205_v35 = vsub.s32 1, %v200_v31  ;;  %s1558_s11 = sshll.u32 %s2150_s2, 4  ;;  %s1559_s11 = int_to_ptr.vmem [resolvable:$true] %s1558_s11 }
  0x81   :  { %1108 = vmatprep.subr.bf16.mxu0 %v1991_v36  ;;  %1310 = vmatprep.subr.bf16.mxu1 %v1994_v37  ;;  %v213_v36 = vsub.s32 3, %v200_v31  ;;  %s2118_s12 = scalar_lea.vmem %s1559_s11, 6656  ;;  %p2123_p3 = scmp.lt.s32.totalorder %s1559_s11, %s1559_s11 }
  0x82   :  { %1065 = vmatprep.mubr.bf16.mxu0 %v2010_v38  ;;  %1267 = vmatprep.mubr.bf16.mxu1 %v2010_v38  ;;  %v2200_v37 = vrot.slane %v197_v34, %v201_v32  ;;  %v2202_v38 = vrot.slane %v197_v34, %v209_v33  ;;  %p2119_p2 = scmp.ne.s32.totalorder %s1559_s11, %s2118_s12  ;;  %p2124_p4 = scmp.lt.s32.totalorder %s2118_s12, %s2118_s12 }
  0x84   :  { %1109 = vmatpush1.bf16.msra.mxu0 %v1989_v39  ;;  %1311 = vmatpush1.bf16.msra.mxu1 %v1992_v40  ;;  %v2204_v39 = vrot.slane %v197_v34, %v205_v35  ;;  %v2206_v40 = vrot.slane %v197_v34, %v213_v36  ;;  %p2125_p5 = por %p2124_p4, %p2123_p3 }
  0x85   :  { %1110 = vmatprep.subr.bf16.mxu0 %v2000_v41  ;;  %1312 = vmatprep.subr.bf16.mxu1 %v2003_v42 }
  0x86   :  { %p2126_p6 = pnand %p2125_p5, %p2119_p2 }
  0x87   :  { %1066 = vmatmul.mubr.bf16.gmra.mrb[16].mxu0 %v2012_v44  ;;  %1268 = vmatmul.mubr.bf16.gmra.mrb[16].mxu1 %v2012_v44 }
  0x88   :  { %1111 = vmatpush1.bf16.msra.mxu0 %v1998_v43  ;;  %1313 = vmatpush1.bf16.msra.mxu1 %v2001_v45 }
  0x89   :  { %1112 = vmatprep.subr.bf16.mxu0 %v2006_v46  ;;  %1314 = vmatprep.subr.bf16.mxu1 %v2009_v47 }
  0x8a   :  { %1075 = vmatprep.mubr.bf16.mxu0 %v2025_v48  ;;  %1277 = vmatprep.mubr.bf16.mxu1 %v2025_v48 }
  0x8c   :  { %1113 = vmatpush1.bf16.msra.mxu0 %v2004_v49  ;;  %1315 = vmatpush1.bf16.msra.mxu1 %v2007_v50 }
  0x8d   :  { %1114 = vmatprep.subr.bf16.mxu0 %v2015_v51  ;;  %1316 = vmatprep.subr.bf16.mxu1 %v2018_v52 }
  0x8f   :  { %1076 = vmatmul.mubr.bf16.gmra.mrb[20].mxu0 %v2027_v53  ;;  %1278 = vmatmul.mubr.bf16.gmra.mrb[20].mxu1 %v2027_v53 }
  0x90   :  { %1115 = vmatpush1.bf16.msra.mxu0 %v2013_v55  ;;  %1317 = vmatpush1.bf16.msra.mxu1 %v2016_v56 }
  0x91   :  { %1116 = vmatprep.subr.bf16.mxu0 %v2021_v57  ;;  %1318 = vmatprep.subr.bf16.mxu1 %v2024_v58 }
  0x92   :  { %1085 = vmatprep.mubr.bf16.mxu0 %v1596_v59  ;;  %1287 = vmatprep.mubr.bf16.mxu1 %v1596_v59 }
  0x94   :  { %1117 = vmatpush1.bf16.msra.mxu0 %v2019_v60  ;;  %1319 = vmatpush1.bf16.msra.mxu1 %v2022_v61 }
  0x95   :  { %1118 = vmatprep.subr.bf16.mxu0 %v2030_v62  ;;  %1320 = vmatprep.subr.bf16.mxu1 %v2033_v63 }
  0x97   :  { %1086 = vmatmul.mubr.bf16.gmra.mrb[24].mxu0 %v1595_v0  ;;  %1288 = vmatmul.mubr.bf16.gmra.mrb[24].mxu1 %v1595_v0 }
  0x98   :  { %1119 = vmatpush1.bf16.msra.mxu0 %v2028_v1  ;;  %1321 = vmatpush1.bf16.msra.mxu1 %v2031_v2 }
  0x99   :  { %1120 = vmatprep.subr.bf16.mxu0 %v2036_v3  ;;  %1322 = vmatprep.subr.bf16.mxu1 %v2039_v4 }
  0x9a   :  { %1126 = vmatprep.mubr.bf16.mxu0 %v2056_v5  ;;  %1328 = vmatprep.mubr.bf16.mxu1 %v2056_v5 }
  0x9c   :  { %1121 = vmatpush1.bf16.msra.mxu0 %v2034_v6  ;;  %1323 = vmatpush1.bf16.msra.mxu1 %v2037_v7 }
  0x9d   :  { %1122 = vmatprep.subr.bf16.mxu0 %v2044_v8  ;;  %1324 = vmatprep.subr.bf16.mxu1 %v2047_v9 }
  0xa0   :  { %1123 = vmatpush1.bf16.msra.mxu0 %v2042_v10  ;;  %1325 = vmatpush1.bf16.msra.mxu1 %v2045_v11 }
  0xa1   :  { %1124 = vmatprep.subr.bf16.mxu0 %v2050_v12  ;;  %1326 = vmatprep.subr.bf16.mxu1 %v2053_v13 }
  0xa4   :  { %1125 = vmatpush1.bf16.msra.mxu0 %v2048_v14  ;;  %1327 = vmatpush1.bf16.msra.mxu1 %v2051_v15 }
  0xa7   :  { %1127 = vmatmul.mubr.bf16.vlgmr.msra.gmra.mrb[0].mxu0 %v2054_v16  ;;  %1329 = vmatmul.mubr.bf16.vlgmr.msra.gmra.mrb[0].mxu1 %v2054_v16 }
  0xa8   :  { %1136 = vmatprep.mubr.bf16.mxu0 %v2057_v17  ;;  %1338 = vmatprep.mubr.bf16.mxu1 %v2057_v17 }
  0xaf   :  { %1137 = vmatmul.mubr.bf16.gmra.mrb[4].mxu0 %v2059_v18  ;;  %1339 = vmatmul.mubr.bf16.gmra.mrb[4].mxu1 %v2059_v18 }
  0xb0   :  { %1146 = vmatprep.mubr.bf16.mxu0 %v2060_v19  ;;  %1348 = vmatprep.mubr.bf16.mxu1 %v2060_v19 }
  0xb7   :  { %1147 = vmatmul.mubr.bf16.gmra.mrb[8].mxu0 %v2062_v20  ;;  %1349 = vmatmul.mubr.bf16.gmra.mrb[8].mxu1 %v2062_v20 }
  0xb8   :  { %1156 = vmatprep.mubr.bf16.mxu0 %v2063_v21  ;;  %1358 = vmatprep.mubr.bf16.mxu1 %v2063_v21 }
  0xbf   :  { %1157 = vmatmul.mubr.bf16.gmra.mrb[12].mxu0 %v2065_v22  ;;  %1359 = vmatmul.mubr.bf16.gmra.mrb[12].mxu1 %v2065_v22 }
  0xc0   :  { %1166 = vmatprep.mubr.bf16.mxu0 %v2066_v23  ;;  %1368 = vmatprep.mubr.bf16.mxu1 %v2066_v23 }
  0xc7   :  { %1167 = vmatmul.mubr.bf16.gmra.mrb[16].mxu0 %v2068_v24  ;;  %1369 = vmatmul.mubr.bf16.gmra.mrb[16].mxu1 %v2068_v24 }
  0xc8   :  { %1176 = vmatprep.mubr.bf16.mxu0 %v2069_v25  ;;  %1378 = vmatprep.mubr.bf16.mxu1 %v2069_v25 }
  0xcf   :  { %1177 = vmatmul.mubr.bf16.gmra.mrb[20].mxu0 %v2071_v27  ;;  %1379 = vmatmul.mubr.bf16.gmra.mrb[20].mxu1 %v2071_v27 }
  0xd0   :  { %1186 = vmatprep.mubr.bf16.mxu0 %v1598_v28  ;;  %1388 = vmatprep.mubr.bf16.mxu1 %v1598_v28 }
  0xd7   :  { %1187 = vmatmul.mubr.bf16.gmra.mrb[24].mxu0 %v1597_v29  ;;  %1389 = vmatmul.mubr.bf16.gmra.mrb[24].mxu1 %v1597_v29 }
 0x17a   :  { %v1128_v41 = vpop.f32.mrb[0].mxu0  ;;  %v1330_v42 = vpop.f32.mrb[0].mxu1 }
 0x17b   :  { %v1727_v43 = vadd.f32 %v1128_v41, %v2200_v37  ;;  %v1753_v44 = vadd.f32 %v1330_v42, %v2202_v38  ;;  %v1130_v45 = vpop.f32.mrb[1].mxu0  ;;  %v1332_v46 = vpop.f32.mrb[1].mxu1 }
 0x17c   :  { %v1728_v47 = vadd.f32 %v1130_v45, %v2204_v39  ;;  %v1754_v48 = vadd.f32 %v1332_v46, %v2206_v40  ;;  %v1132_v49 = vpop.f32.mrb[2].mxu0  ;;  %v1334_v50 = vpop.f32.mrb[2].mxu1 }
 0x17d   :  { %v1397_v51 = vmul.f32 0.01, %v1727_v43  ;;  %v1399_v52 = vmul.f32 0.01, %v1753_v44  ;;  %v1729_v53 = vadd.f32 %v1132_v49, %v2200_v37  ;;  %v1755_v54 = vadd.f32 %v1334_v50, %v2202_v38  ;;  %v1134_v55 = vpop.f32.mrb[3].mxu0  ;;  %v1336_v56 = vpop.f32.mrb[3].mxu1 }
 0x17e   :  { %v1398_v57 = vmul.f32 0.01, %v1728_v47  ;;  %v1400_v58 = vmul.f32 0.01, %v1754_v48  ;;  %v1730_v59 = vadd.f32 %v1134_v55, %v2204_v39  ;;  %v1756_v60 = vadd.f32 %v1336_v56, %v2206_v40 }
 0x17f   :  { %v1449_v61 = vmax.f32 %v1727_v43, %v1397_v51  ;;  %v1451_v62 = vmax.f32 %v1753_v44, %v1399_v52  ;;  %v1401_v63 = vmul.f32 0.01, %v1729_v53  ;;  %v1403_v0 = vmul.f32 0.01, %v1755_v54 }
 0x180   :  { %v1450_v1 = vmax.f32 %v1728_v47, %v1398_v57  ;;  %v1452_v2 = vmax.f32 %v1754_v48, %v1400_v58  ;;  %v1402_v3 = vmul.f32 0.01, %v1730_v59  ;;  %v1404_v4 = vmul.f32 0.01, %v1756_v60 }
 0x181   :  { %1501 = vst [vmem:[#allocation7] sm:$0xff] %v1449_v61  ;;  %1503 = vst [vmem:[#allocation7 + $0x10] sm:$0xff] %v1451_v62  ;;  %v1453_v5 = vmax.f32 %v1729_v53, %v1401_v63  ;;  %v1455_v6 = vmax.f32 %v1755_v54, %v1403_v0 }
 0x182   :  { %1502 = vst [vmem:[#allocation7 + $0x8] sm:$0xff] %v1450_v1  ;;  %1504 = vst [vmem:[#allocation7 + $0x18] sm:$0xff] %v1452_v2  ;;  %v1454_v7 = vmax.f32 %v1730_v59, %v1402_v3  ;;  %v1456_v8 = vmax.f32 %v1756_v60, %v1404_v4  ;;  %v1138_v9 = vpop.f32.mrb[4].mxu0  ;;  %v1340_v10 = vpop.f32.mrb[4].mxu1 }
 0x183   :  { %1505 = vst [vmem:[#allocation7 + $0x20] sm:$0xff] %v1453_v5  ;;  %1507 = vst [vmem:[#allocation7 + $0x30] sm:$0xff] %v1455_v6  ;;  %v1731_v11 = vadd.f32 %v1138_v9, %v2200_v37  ;;  %v1757_v12 = vadd.f32 %v1340_v10, %v2202_v38  ;;  %v1140_v13 = vpop.f32.mrb[5].mxu0  ;;  %v1342_v14 = vpop.f32.mrb[5].mxu1 }
 0x184   :  { %1506 = vst [vmem:[#allocation7 + $0x28] sm:$0xff] %v1454_v7  ;;  %1508 = vst [vmem:[#allocation7 + $0x38] sm:$0xff] %v1456_v8  ;;  %v1732_v15 = vadd.f32 %v1140_v13, %v2204_v39  ;;  %v1758_v16 = vadd.f32 %v1342_v14, %v2206_v40  ;;  %v1142_v17 = vpop.f32.mrb[6].mxu0  ;;  %v1344_v18 = vpop.f32.mrb[6].mxu1 }
 0x185   :  { %v1405_v19 = vmul.f32 0.01, %v1731_v11  ;;  %v1407_v20 = vmul.f32 0.01, %v1757_v12  ;;  %v1733_v21 = vadd.f32 %v1142_v17, %v2200_v37  ;;  %v1759_v22 = vadd.f32 %v1344_v18, %v2202_v38  ;;  %v1144_v23 = vpop.f32.mrb[7].mxu0  ;;  %v1346_v24 = vpop.f32.mrb[7].mxu1 }
 0x186   :  { %v1406_v25 = vmul.f32 0.01, %v1732_v15  ;;  %v1408_v26 = vmul.f32 0.01, %v1758_v16  ;;  %v1734_v27 = vadd.f32 %v1144_v23, %v2204_v39  ;;  %v1760_v28 = vadd.f32 %v1346_v24, %v2206_v40 }
 0x187   :  { %v1457_v29 = vmax.f32 %v1731_v11, %v1405_v19  ;;  %v1459_v30 = vmax.f32 %v1757_v12, %v1407_v20  ;;  %v1409_v31 = vmul.f32 0.01, %v1733_v21  ;;  %v1411_v32 = vmul.f32 0.01, %v1759_v22 }
 0x188   :  { %v1458_v33 = vmax.f32 %v1732_v15, %v1406_v25  ;;  %v1460_v34 = vmax.f32 %v1758_v16, %v1408_v26  ;;  %v1410_v35 = vmul.f32 0.01, %v1734_v27  ;;  %v1412_v36 = vmul.f32 0.01, %v1760_v28 }
 0x189   :  { %1509 = vst [vmem:[#allocation7 + $0x40] sm:$0xff] %v1457_v29  ;;  %1511 = vst [vmem:[#allocation7 + $0x50] sm:$0xff] %v1459_v30  ;;  %v1461_v41 = vmax.f32 %v1733_v21, %v1409_v31  ;;  %v1463_v42 = vmax.f32 %v1759_v22, %v1411_v32 }
 0x18a   :  { %1510 = vst [vmem:[#allocation7 + $0x48] sm:$0xff] %v1458_v33  ;;  %1512 = vst [vmem:[#allocation7 + $0x58] sm:$0xff] %v1460_v34  ;;  %v1462_v43 = vmax.f32 %v1734_v27, %v1410_v35  ;;  %v1464_v44 = vmax.f32 %v1760_v28, %v1412_v36  ;;  %v1148_v45 = vpop.f32.mrb[8].mxu0  ;;  %v1350_v46 = vpop.f32.mrb[8].mxu1 }
 0x18b   :  { %1513 = vst [vmem:[#allocation7 + $0x60] sm:$0xff] %v1461_v41  ;;  %1515 = vst [vmem:[#allocation7 + $0x70] sm:$0xff] %v1463_v42  ;;  %v1735_v47 = vadd.f32 %v1148_v45, %v2200_v37  ;;  %v1761_v48 = vadd.f32 %v1350_v46, %v2202_v38  ;;  %v1150_v49 = vpop.f32.mrb[9].mxu0  ;;  %v1352_v50 = vpop.f32.mrb[9].mxu1 }
 0x18c   :  { %1514 = vst [vmem:[#allocation7 + $0x68] sm:$0xff] %v1462_v43  ;;  %1516 = vst [vmem:[#allocation7 + $0x78] sm:$0xff] %v1464_v44  ;;  %v1736_v51 = vadd.f32 %v1150_v49, %v2204_v39  ;;  %v1762_v52 = vadd.f32 %v1352_v50, %v2206_v40  ;;  %v1152_v53 = vpop.f32.mrb[10].mxu0  ;;  %v1354_v54 = vpop.f32.mrb[10].mxu1 }
 0x18d   :  { %v1413_v55 = vmul.f32 0.01, %v1735_v47  ;;  %v1415_v56 = vmul.f32 0.01, %v1761_v48  ;;  %v1737_v57 = vadd.f32 %v1152_v53, %v2200_v37  ;;  %v1763_v58 = vadd.f32 %v1354_v54, %v2202_v38  ;;  %v1154_v59 = vpop.f32.mrb[11].mxu0  ;;  %v1356_v60 = vpop.f32.mrb[11].mxu1 }
 0x18e   :  { %v1414_v61 = vmul.f32 0.01, %v1736_v51  ;;  %v1416_v62 = vmul.f32 0.01, %v1762_v52  ;;  %v1738_v63 = vadd.f32 %v1154_v59, %v2204_v39  ;;  %v1764_v0 = vadd.f32 %v1356_v60, %v2206_v40 }
 0x18f   :  { %v1465_v1 = vmax.f32 %v1735_v47, %v1413_v55  ;;  %v1467_v2 = vmax.f32 %v1761_v48, %v1415_v56  ;;  %v1417_v3 = vmul.f32 0.01, %v1737_v57  ;;  %v1419_v4 = vmul.f32 0.01, %v1763_v58 }
 0x190   :  { %v1466_v5 = vmax.f32 %v1736_v51, %v1414_v61  ;;  %v1468_v6 = vmax.f32 %v1762_v52, %v1416_v62  ;;  %v1418_v7 = vmul.f32 0.01, %v1738_v63  ;;  %v1420_v8 = vmul.f32 0.01, %v1764_v0 }
 0x191   :  { %1517 = vst [vmem:[#allocation7 + $0x80] sm:$0xff] %v1465_v1  ;;  %1519 = vst [vmem:[#allocation7 + $0x90] sm:$0xff] %v1467_v2  ;;  %v1469_v9 = vmax.f32 %v1737_v57, %v1417_v3  ;;  %v1471_v10 = vmax.f32 %v1763_v58, %v1419_v4 }
 0x192   :  { %1518 = vst [vmem:[#allocation7 + $0x88] sm:$0xff] %v1466_v5  ;;  %1520 = vst [vmem:[#allocation7 + $0x98] sm:$0xff] %v1468_v6  ;;  %v1470_v11 = vmax.f32 %v1738_v63, %v1418_v7  ;;  %v1472_v12 = vmax.f32 %v1764_v0, %v1420_v8  ;;  %v1158_v13 = vpop.f32.mrb[12].mxu0  ;;  %v1360_v14 = vpop.f32.mrb[12].mxu1 }
 0x193   :  { %1521 = vst [vmem:[#allocation7 + $0xa0] sm:$0xff] %v1469_v9  ;;  %1523 = vst [vmem:[#allocation7 + $0xb0] sm:$0xff] %v1471_v10  ;;  %v1739_v15 = vadd.f32 %v1158_v13, %v2200_v37  ;;  %v1765_v16 = vadd.f32 %v1360_v14, %v2202_v38  ;;  %v1160_v17 = vpop.f32.mrb[13].mxu0  ;;  %v1362_v18 = vpop.f32.mrb[13].mxu1 }
 0x194   :  { %1522 = vst [vmem:[#allocation7 + $0xa8] sm:$0xff] %v1470_v11  ;;  %1524 = vst [vmem:[#allocation7 + $0xb8] sm:$0xff] %v1472_v12  ;;  %v1740_v19 = vadd.f32 %v1160_v17, %v2204_v39  ;;  %v1766_v20 = vadd.f32 %v1362_v18, %v2206_v40  ;;  %v1162_v21 = vpop.f32.mrb[14].mxu0  ;;  %v1364_v22 = vpop.f32.mrb[14].mxu1 }
 0x195   :  { %v1421_v23 = vmul.f32 0.01, %v1739_v15  ;;  %v1423_v24 = vmul.f32 0.01, %v1765_v16  ;;  %v1741_v25 = vadd.f32 %v1162_v21, %v2200_v37  ;;  %v1767_v26 = vadd.f32 %v1364_v22, %v2202_v38  ;;  %v1164_v27 = vpop.f32.mrb[15].mxu0  ;;  %v1366_v28 = vpop.f32.mrb[15].mxu1 }
 0x196   :  { %v1422_v29 = vmul.f32 0.01, %v1740_v19  ;;  %v1424_v30 = vmul.f32 0.01, %v1766_v20  ;;  %v1742_v31 = vadd.f32 %v1164_v27, %v2204_v39  ;;  %v1768_v32 = vadd.f32 %v1366_v28, %v2206_v40 }
 0x197   :  { %v1473_v33 = vmax.f32 %v1739_v15, %v1421_v23  ;;  %v1475_v34 = vmax.f32 %v1765_v16, %v1423_v24  ;;  %v1425_v35 = vmul.f32 0.01, %v1741_v25  ;;  %v1427_v36 = vmul.f32 0.01, %v1767_v26 }
 0x198   :  { %v1474_v41 = vmax.f32 %v1740_v19, %v1422_v29  ;;  %v1476_v42 = vmax.f32 %v1766_v20, %v1424_v30  ;;  %v1426_v43 = vmul.f32 0.01, %v1742_v31  ;;  %v1428_v44 = vmul.f32 0.01, %v1768_v32 }
 0x199   :  { %1525 = vst [vmem:[#allocation7 + $0xc0] sm:$0xff] %v1473_v33  ;;  %1527 = vst [vmem:[#allocation7 + $0xd0] sm:$0xff] %v1475_v34  ;;  %v1477_v45 = vmax.f32 %v1741_v25, %v1425_v35  ;;  %v1479_v46 = vmax.f32 %v1767_v26, %v1427_v36 }
 0x19a   :  { %1526 = vst [vmem:[#allocation7 + $0xc8] sm:$0xff] %v1474_v41  ;;  %1528 = vst [vmem:[#allocation7 + $0xd8] sm:$0xff] %v1476_v42  ;;  %v1478_v47 = vmax.f32 %v1742_v31, %v1426_v43  ;;  %v1480_v48 = vmax.f32 %v1768_v32, %v1428_v44  ;;  %v1168_v49 = vpop.f32.mrb[16].mxu0  ;;  %v1370_v50 = vpop.f32.mrb[16].mxu1 }
 0x19b   :  { %1529 = vst [vmem:[#allocation7 + $0xe0] sm:$0xff] %v1477_v45  ;;  %1531 = vst [vmem:[#allocation7 + $0xf0] sm:$0xff] %v1479_v46  ;;  %v1743_v51 = vadd.f32 %v1168_v49, %v2200_v37  ;;  %v1769_v52 = vadd.f32 %v1370_v50, %v2202_v38  ;;  %v1170_v53 = vpop.f32.mrb[17].mxu0  ;;  %v1372_v54 = vpop.f32.mrb[17].mxu1 }
 0x19c   :  { %1530 = vst [vmem:[#allocation7 + $0xe8] sm:$0xff] %v1478_v47  ;;  %1532 = vst [vmem:[#allocation7 + $0xf8] sm:$0xff] %v1480_v48  ;;  %v1744_v55 = vadd.f32 %v1170_v53, %v2204_v39  ;;  %v1770_v56 = vadd.f32 %v1372_v54, %v2206_v40  ;;  %v1172_v57 = vpop.f32.mrb[18].mxu0  ;;  %v1374_v58 = vpop.f32.mrb[18].mxu1 }
 0x19d   :  { %v1429_v59 = vmul.f32 0.01, %v1743_v51  ;;  %v1431_v60 = vmul.f32 0.01, %v1769_v52  ;;  %v1745_v61 = vadd.f32 %v1172_v57, %v2200_v37  ;;  %v1771_v62 = vadd.f32 %v1374_v58, %v2202_v38  ;;  %v1174_v63 = vpop.f32.mrb[19].mxu0  ;;  %v1376_v0 = vpop.f32.mrb[19].mxu1 }
 0x19e   :  { %v1430_v1 = vmul.f32 0.01, %v1744_v55  ;;  %v1432_v2 = vmul.f32 0.01, %v1770_v56  ;;  %v1746_v3 = vadd.f32 %v1174_v63, %v2204_v39  ;;  %v1772_v4 = vadd.f32 %v1376_v0, %v2206_v40 }
 0x19f   :  { %v1481_v5 = vmax.f32 %v1743_v51, %v1429_v59  ;;  %v1483_v6 = vmax.f32 %v1769_v52, %v1431_v60  ;;  %v1433_v7 = vmul.f32 0.01, %v1745_v61  ;;  %v1435_v8 = vmul.f32 0.01, %v1771_v62 }
 0x1a0   :  { %v1482_v9 = vmax.f32 %v1744_v55, %v1430_v1  ;;  %v1484_v10 = vmax.f32 %v1770_v56, %v1432_v2  ;;  %v1434_v11 = vmul.f32 0.01, %v1746_v3  ;;  %v1436_v12 = vmul.f32 0.01, %v1772_v4 }
 0x1a1   :  { %1533 = vst [vmem:[#allocation7 + $0x100] sm:$0xff] %v1481_v5  ;;  %1535 = vst [vmem:[#allocation7 + $0x110] sm:$0xff] %v1483_v6  ;;  %v1485_v13 = vmax.f32 %v1745_v61, %v1433_v7  ;;  %v1487_v14 = vmax.f32 %v1771_v62, %v1435_v8 }
 0x1a2   :  { %1534 = vst [vmem:[#allocation7 + $0x108] sm:$0xff] %v1482_v9  ;;  %1536 = vst [vmem:[#allocation7 + $0x118] sm:$0xff] %v1484_v10  ;;  %v1486_v15 = vmax.f32 %v1746_v3, %v1434_v11  ;;  %v1488_v16 = vmax.f32 %v1772_v4, %v1436_v12  ;;  %v1178_v17 = vpop.f32.mrb[20].mxu0  ;;  %v1380_v18 = vpop.f32.mrb[20].mxu1 }
 0x1a3   :  { %1537 = vst [vmem:[#allocation7 + $0x120] sm:$0xff] %v1485_v13  ;;  %1539 = vst [vmem:[#allocation7 + $0x130] sm:$0xff] %v1487_v14  ;;  %v1747_v19 = vadd.f32 %v1178_v17, %v2200_v37  ;;  %v1773_v20 = vadd.f32 %v1380_v18, %v2202_v38  ;;  %v1180_v21 = vpop.f32.mrb[21].mxu0  ;;  %v1382_v22 = vpop.f32.mrb[21].mxu1 }
 0x1a4   :  { %1538 = vst [vmem:[#allocation7 + $0x128] sm:$0xff] %v1486_v15  ;;  %1540 = vst [vmem:[#allocation7 + $0x138] sm:$0xff] %v1488_v16  ;;  %v1748_v23 = vadd.f32 %v1180_v21, %v2204_v39  ;;  %v1774_v24 = vadd.f32 %v1382_v22, %v2206_v40  ;;  %v1182_v25 = vpop.f32.mrb[22].mxu0  ;;  %v1384_v26 = vpop.f32.mrb[22].mxu1 }
 0x1a5   :  { %v1437_v27 = vmul.f32 0.01, %v1747_v19  ;;  %v1439_v28 = vmul.f32 0.01, %v1773_v20  ;;  %v1749_v29 = vadd.f32 %v1182_v25, %v2200_v37  ;;  %v1775_v30 = vadd.f32 %v1384_v26, %v2202_v38  ;;  %v1184_v31 = vpop.f32.mrb[23].mxu0  ;;  %v1386_v32 = vpop.f32.mrb[23].mxu1 }
 0x1a6   :  { %v1438_v33 = vmul.f32 0.01, %v1748_v23  ;;  %v1440_v34 = vmul.f32 0.01, %v1774_v24  ;;  %v1750_v35 = vadd.f32 %v1184_v31, %v2204_v39  ;;  %v1776_v36 = vadd.f32 %v1386_v32, %v2206_v40 }
 0x1a7   :  { %v1489_v41 = vmax.f32 %v1747_v19, %v1437_v27  ;;  %v1491_v42 = vmax.f32 %v1773_v20, %v1439_v28  ;;  %v1441_v43 = vmul.f32 0.01, %v1749_v29  ;;  %v1443_v44 = vmul.f32 0.01, %v1775_v30 }
 0x1a8   :  { %v1490_v45 = vmax.f32 %v1748_v23, %v1438_v33  ;;  %v1492_v46 = vmax.f32 %v1774_v24, %v1440_v34  ;;  %v1442_v47 = vmul.f32 0.01, %v1750_v35  ;;  %v1444_v48 = vmul.f32 0.01, %v1776_v36 }
 0x1a9   :  { %1541 = vst [vmem:[#allocation7 + $0x140] sm:$0xff] %v1489_v41  ;;  %1543 = vst [vmem:[#allocation7 + $0x150] sm:$0xff] %v1491_v42  ;;  %v1493_v49 = vmax.f32 %v1749_v29, %v1441_v43  ;;  %v1495_v50 = vmax.f32 %v1775_v30, %v1443_v44 }
 0x1aa   :  { %1542 = vst [vmem:[#allocation7 + $0x148] sm:$0xff] %v1490_v45  ;;  %1544 = vst [vmem:[#allocation7 + $0x158] sm:$0xff] %v1492_v46  ;;  %v1494_v51 = vmax.f32 %v1750_v35, %v1442_v47  ;;  %v1496_v52 = vmax.f32 %v1776_v36, %v1444_v48  ;;  %v1188_v53 = vpop.f32.mrb[24].mxu0  ;;  %v1390_v54 = vpop.f32.mrb[24].mxu1 }
 0x1ab   :  { %1545 = vst [vmem:[#allocation7 + $0x160] sm:$0xff] %v1493_v49  ;;  %1547 = vst [vmem:[#allocation7 + $0x170] sm:$0xff] %v1495_v50  ;;  %v1751_v55 = vadd.f32 %v1188_v53, %v2200_v37  ;;  %v1777_v56 = vadd.f32 %v1390_v54, %v2202_v38  ;;  %v1190_v57 = vpop.f32.mrb[25].mxu0  ;;  %v1392_v58 = vpop.f32.mrb[25].mxu1 }
 0x1ac   :  { %1546 = vst [vmem:[#allocation7 + $0x168] sm:$0xff] %v1494_v51  ;;  %1548 = vst [vmem:[#allocation7 + $0x178] sm:$0xff] %v1496_v52  ;;  %v1752_v59 = vadd.f32 %v1190_v57, %v2204_v39  ;;  %v1778_v60 = vadd.f32 %v1392_v58, %v2206_v40  ;;  %v1192_v61 = vpop.f32.mrb[26].mxu0  ;;  %v1394_v62 = vpop.f32.mrb[26].mxu1 }
 0x1ad   :  { %v1445_v63 = vmul.f32 0.01, %v1751_v55  ;;  %v1447_v0 = vmul.f32 0.01, %v1777_v56  ;;  %v1193_v1 = vpop.f32.mrb[27].mxu0  ;;  %v1395_v2 = vpop.f32.mrb[27].mxu1 }
 0x1ae   :  { %v1446_v3 = vmul.f32 0.01, %v1752_v59  ;;  %v1448_v37 = vmul.f32 0.01, %v1778_v60 }
 0x1af   :  { %v1497_v4 = vmax.f32 %v1751_v55, %v1445_v63  ;;  %v1499_v38 = vmax.f32 %v1777_v56, %v1447_v0 }
 0x1b0   :  { %v1498_v5 = vmax.f32 %v1752_v59, %v1446_v3  ;;  %v1500_v6 = vmax.f32 %v1778_v60, %v1448_v37 }
 0x1b1   :  { %1549 = vst [vmem:[#allocation7 + $0x180] sm:$0xff] %v1497_v4  ;;  %1551 = vst [vmem:[#allocation7 + $0x190] sm:$0xff] %v1499_v38 }
 0x1b2   :  { %1550 = vst [vmem:[#allocation7 + $0x188] sm:$0xff] %v1498_v5  ;;  %1552 = vst [vmem:[#allocation7 + $0x198] sm:$0xff] %v1500_v6 }
 0x1b3   :  { %2129 = shalt.err (!%p2126_p6)
}
 0x1b4   :  { %s2130_s15 = scalar_lea.hbm %s2275_s3, 6656 }
 0x1b5   :  { %p2131_p7 = scmp.ne.s32.totalorder %s2275_s3, %s2130_s15  ;;  %p2134_p8 = scmp.lt.u32.totalorder %s2130_s15, %s2275_s3 }
 0x1b7   :  { %p2136_p9 = pnand %p2134_p8, %p2131_p7 }
 0x1b9   :  { %2139 = shalt.err (!%p2136_p9)
}
 0x1ba   :  { %s2151_s20 = smov 512   ;;  %s2152_s21 = smov 32  }
 0x1bb   :  { %1564 = dma.vmem_to_hbm [thread:$0]  %s1559_s11, 6656, %s2275_s3, [#allocation4], %s2151_s20, %s2151_s20, %s2152_s21  }
 0x1bc   :  { %2144 = dma.done.wait [#allocation4], 6656  }
 0x1bd   :  { %2145 = vsyncadd [#allocation4], 4294960640 }
 0x1be   :  { %1568 = vsyncpa [#allocation3], 1 }
 0x1bf   :  { %1569 = vsyncpa [#allocation6], 1 }
 0x1c0   :  { %1570 = vsyncpa [#allocation4], 1 }

</bundles_post_ra>
